<compile_context>
chip_gen: v7x
topology: tpu7x:2x2x1
jax: 0.10.0
libtpu: 0.0.40
codegen_flags: <defaults>
</compile_context>

<pallas_src>
import jax
import jax.numpy as jnp
from jax.experimental import pallas as pl
from jax.experimental.pallas import tpu as pltpu


def _silu_kernel(x_ref, o_ref):
    # Elementwise hot path; upcast to f32 for the sigmoid then cast back.
    x = x_ref[...].astype(jnp.float32)
    o_ref[...] = (x * jax.nn.sigmoid(x)).astype(o_ref.dtype)


def _round_up(n, m):
    return ((n + m - 1) // m) * m


def _round_down(n, m):
    return (n // m) * m


def _pick_lane_width(n, max_lane=2048):
    """Largest multiple of 128 (<= max_lane) that divides n, else 0."""
    for lanes in range(max_lane, 0, -128):
        if n % lanes == 0:
            return lanes
    return 0


def _silu_2d(x2d, *, vmem_cap_bytes=40 << 20):
    """Pallas SiLU over a lane-dense (rows, L) slab with L % 128 == 0."""
    rows, L = x2d.shape
    dtype = x2d.dtype
    itemsize = jnp.dtype(dtype).itemsize
    # dtype-aware sublane packing: fp32 -> 8, bf16/fp16 -> 16, int8/fp8 -> 32.
    sublane = {4: 8, 2: 16, 1: 32}.get(itemsize, 8)

    # Dtype-invariant tile *byte* target, derived so that
    #   2x double-buffered (in + out) tiles + one f32 intermediate of the tile
    # fits under vmem_cap_bytes:  bytes per tile-byte = 4 + 4/itemsize.
    # fp32 -> ~8 MiB tiles, bf16 -> ~6.7 MiB, int8 -> ~5 MiB.
    target_tile_bytes = vmem_cap_bytes // (4 + 4 // itemsize)
    tile_rows = max(sublane,
                    _round_down(target_tile_bytes // (L * itemsize), sublane))
    # Keep the 1-D parallel grid >= 2 so megacore (v7x) can shard it; harmless
    # on single-TC v5e / v6e.
    tile_rows = min(tile_rows, _round_up(-(-rows // 2), sublane))

    if tile_rows >= rows:
        tile_rows = rows                     # single block == full array
        grid = 1
    else:
        grid = -(-rows // tile_rows)         # last block may be partial; masked

    tile_bytes = tile_rows * L * itemsize
    # 2x double-buffered in + out tiles, f32 intermediate, headroom.
    vmem_limit = 4 * tile_bytes + tile_rows * L * 4 + (4 << 20)
    vmem_limit = min(max(vmem_limit, 16 << 20), 48 << 20)

    return pl.pallas_call(
        _silu_kernel,
        out_shape=jax.ShapeDtypeStruct((rows, L), dtype),
        grid_spec=pltpu.PrefetchScalarGridSpec(
            num_scalar_prefetch=0,
            grid=(grid,),
            in_specs=[pl.BlockSpec((tile_rows, L), lambda i: (i, 0))],
            out_specs=pl.BlockSpec((tile_rows, L), lambda i: (i, 0)),
        ),
        compiler_params=pltpu.CompilerParams(
            dimension_semantics=("parallel",),   # megacore-shardable on v7x
            vmem_limit_bytes=int(vmem_limit),
        ),
    )(x2d)


def silu(x):
    """SiLU over an arbitrarily-shaped array. Same shape/dtype as x."""
    orig_shape = x.shape
    n = x.size
    if n == 0:
        return x

    # Zero-copy path: a multiple of 128 divides n, so the 2-D reshape is free.
    # Covers all common transformer shapes (trailing dims multiple of 128).
    L = _pick_lane_width(n)
    if L > 0:
        x2d = x.reshape(-1, L)               # contiguous reshape: no copy
        return _silu_2d(x2d).reshape(orig_shape)

    # Rare fallback: n not divisible by 128.  Kernel handles the 128-aligned
    # prefix; the < 128-element remainder is a tiny plain-jnp epilogue.
    x_flat = x.reshape(-1)
    n_main = _round_down(n, 128)
    parts = []
    if n_main > 0:
        parts.append(_silu_2d(x_flat[:n_main].reshape(-1, 128)).reshape(-1))
    tail = x_flat[n_main:].astype(jnp.float32)
    parts.append((tail * jax.nn.sigmoid(tail)).astype(x.dtype))
    return jnp.concatenate(parts).reshape(orig_shape)


if __name__ == "__main__":
    key = jax.random.PRNGKey(0)

    def ref_silu(v):
        v32 = v.astype(jnp.float32)
        return (v32 * jax.nn.sigmoid(v32)).astype(v.dtype)

    # Primary shape implied by the module usage: (batch=2, seq=8, hidden=32).
    x = jax.random.normal(key, (2, 8, 32), dtype=jnp.float32)
    out = silu(x)
    jax.block_until_ready(out)
    assert out.shape == x.shape and out.dtype == x.dtype
    assert jnp.allclose(out, ref_silu(x), atol=1e-5, rtol=1e-5)

    # Small extra shapes covering the multi-block (grid > 1), partial-last-block
    # and non-128-divisible fallback paths.
    for shape, dtype in [((16, 128, 128), jnp.float32),   # grid == 2
                         ((20, 2048), jnp.bfloat16),      # partial last block
                         ((3, 43), jnp.float32)]:         # 128-remainder tail
        key, sub = jax.random.split(key)
        xi = jax.random.normal(sub, shape, dtype=dtype)
        oi = silu(xi)
        jax.block_until_ready(oi)
        assert oi.shape == xi.shape and oi.dtype == xi.dtype
        tol = 1e-2 if dtype == jnp.bfloat16 else 1e-5
        assert jnp.allclose(oi.astype(jnp.float32),
                            ref_silu(xi).astype(jnp.float32),
                            atol=tol, rtol=tol)

    print("KERNEL_OK")
</pallas_src>

<mosaic_0001>
module attributes {stable_mosaic.version = 11 : i64} {
  func.func @_silu_kernel(%arg0: i32, %arg1: memref<1x512xf32, #tpu.memory_space<vmem>>, %arg2: memref<1x512xf32, #tpu.memory_space<vmem>>) attributes {dimension_semantics = [#tpu.dimension_semantics<parallel>], iteration_bounds = array<i64: 1>, scalar_prefetch = 0 : i64, scratch_operands = 0 : i64, tpu.core_type = #tpu.core_type<tc>, window_params = [{transform_indices = @transform_0, window_bounds = array<i64: 1, 512>}, {transform_indices = @transform_1, window_bounds = array<i64: 1, 512>}]} {
    %c0 = arith.constant 0 : index
    %c0_0 = arith.constant 0 : index
    %0 = vector.load %arg1[%c0, %c0_0] : memref<1x512xf32, #tpu.memory_space<vmem>>, vector<1x512xf32>
    %1 = arith.negf %0 : vector<1x512xf32>
    %2 = math.exp %1 : vector<1x512xf32>
    %cst = arith.constant 1.000000e+00 : f32
    %3 = vector.broadcast %cst : f32 to vector<1x512xf32>
    %4 = arith.addf %3, %2 : vector<1x512xf32>
    %5 = arith.divf %3, %4 : vector<1x512xf32>
    %6 = arith.mulf %0, %5 : vector<1x512xf32>
    %c0_1 = arith.constant 0 : index
    %c0_2 = arith.constant 0 : index
    %7 = vector.load %arg2[%c0_1, %c0_2] : memref<1x512xf32, #tpu.memory_space<vmem>>, vector<1x512xf32>
    tpu.vector_store %arg2[%c0_1, %c0_2], %6 {strides = array<i32>} : memref<1x512xf32, #tpu.memory_space<vmem>>, vector<1x512xf32>,
    return
  }
  func.func @transform_0(%arg0: i32) -> (i32, i32) {
    %c0_i32 = arith.constant 0 : i32
    %c0_i32_0 = arith.constant 0 : i32
    return %arg0, %c0_i32 : i32, i32
  }
  func.func @transform_1(%arg0: i32) -> (i32, i32) {
    %c0_i32 = arith.constant 0 : i32
    %c0_i32_0 = arith.constant 0 : i32
    return %arg0, %c0_i32 : i32, i32
  }
}

</mosaic_0001>

<bundles_post_ra>
// kernel: tpu_custom_call.1
= control target key start
LH: loop header
LB: loop body
LE: loop exit
PB: predicated region body
PF: predicated region fallthrough
CT: control target
= control target key end

     0   :  { %6 = vsyncpa [#allocation3], 0  ;;  %s140_s0 = inlined_call_operand.hbm [shape: f32[1,512], index: 0, kind: input, shape index: {}]   ;;  %s141_s1 = inlined_call_operand.hbm [shape: f32[1,512], index: 1, kind: output, shape index: {}]  }
   0x1   :  { %7 = vsyncpa [#allocation4], 0  ;;  %s104_s6 = smov [#allocation2]   ;;  %s56_s10 = scalar_lea.hbm %s140_s0, 64 }
   0x2   :  { %s14_s7 = sshll.u32 %s104_s6, 4  ;;  %p57_p0 = scmp.ne.s32.totalorder %s140_s0, %s56_s10  ;;  %s15_s7 = int_to_ptr.vmem [resolvable:$true] %s14_s7 }
   0x3   :  { %p60_p1 = scmp.lt.u32.totalorder %s56_s10, %s140_s0 }
   0x5   :  { %p62_p2 = pnand %p60_p1, %p57_p0 }
   0x7   :  { %65 = shalt.err (!%p62_p2)
}
   0x8   :  { %s66_s15 = scalar_lea.vmem %s15_s7, 64  ;;  %p71_p4 = scmp.lt.s32.totalorder %s15_s7, %s15_s7 }
   0x9   :  { %p67_p3 = scmp.ne.s32.totalorder %s15_s7, %s66_s15  ;;  %p72_p5 = scmp.lt.s32.totalorder %s66_s15, %s66_s15 }
   0xb   :  { %p73_p6 = por %p72_p5, %p71_p4 }
   0xd   :  { %p74_p7 = pnand %p73_p6, %p67_p3 }
   0xf   :  { %77 = shalt.err (!%p74_p7)
}
  0x10   :  { %17 = dma.hbm_to_vmem [thread:$0]  %s140_s0, 64, %s15_s7, [#allocation3]  }
  0x11   :  { %100 = dma.done.wait [#allocation3], 64  }
  0x12   :  { %101 = vsyncadd [#allocation3], 4294967232  ;;  %v21_v0 = vld [vmem:[#allocation2] sm:$0xf]  ;;  %v29_v4 = vlaneseq  ;;  %s105_s18 = smov [#allocation5]  }
  0x13   :  { %v49_v1 = vmul.f32 -1.442695, %v21_v0  ;;  %s40_s19 = sshll.u32 %s105_s18, 4  ;;  %s41_s19 = int_to_ptr.vmem [resolvable:$true] %s40_s19 }
  0x14   :  { %vm31_vm0 = vcmp.lt.s32.totalorder %v29_v4, 512  ;;  %s78_s20 = scalar_lea.vmem %s41_s19, 64  ;;  %p83_p9 = scmp.lt.s32.totalorder %s41_s19, %s41_s19 }
  0x15   :  { %52 = vpow2.f32 %v49_v1  ;;  %p79_p8 = scmp.ne.s32.totalorder %s41_s19, %s78_s20  ;;  %p84_p10 = scmp.lt.s32.totalorder %s78_s20, %s78_s20 }
  0x17   :  { %p85_p11 = por %p84_p10, %p83_p9 }
  0x19   :  { %p86_p12 = pnand %p85_p11, %p79_p8 }
  0x1f   :  { %v53_v2 = vpop.eup %52 }
  0x20   :  { %v25_v3 = vadd.f32 1.0, %v53_v2 }
  0x22   :  { %54 = vrcp.f32 %v25_v3 }
  0x2c   :  { %v55_v5 = vpop.eup %54 }
  0x2d   :  { %v28_v6 = vmul.f32 %v55_v5, %v21_v0 }
  0x2f   :  { %33 = vst.msk [vmem:[#allocation5] sm:$0xf] %vm31_vm0, %v28_v6 }
  0x30   :  { %89 = shalt.err (!%p86_p12)
}
  0x31   :  { %s90_s22 = scalar_lea.hbm %s141_s1, 64 }
  0x32   :  { %p91_p13 = scmp.ne.s32.totalorder %s141_s1, %s90_s22  ;;  %p94_p0 = scmp.lt.u32.totalorder %s90_s22, %s141_s1 }
  0x34   :  { %p96_p1 = pnand %p94_p0, %p91_p13 }
  0x36   :  { %99 = shalt.err (!%p96_p1)
}
  0x37   :  { %43 = dma.vmem_to_hbm [thread:$0]  %s41_s19, 64, %s141_s1, [#allocation4]  }
  0x38   :  { %102 = dma.done.wait [#allocation4], 64  }
  0x39   :  { %103 = vsyncadd [#allocation4], 4294967232 }
  0x3a   :  { %47 = vsyncpa [#allocation3], 1 }
  0x3b   :  { %48 = vsyncpa [#allocation4], 1 }

</bundles_post_ra>
